<compile_context>
chip_gen: v5e
topology: v5e:2x2
jax: 0.10.0
libtpu: 0.0.40
codegen_flags: <defaults>
</compile_context>

<pallas_src>
import jax
import jax.numpy as jnp
from jax.experimental import pallas as pl
from jax.experimental.pallas import tpu as pltpu


# ------------------------------ fused kernel ------------------------------

def _make_block_kernel(L, E, n_head, scale):
    hd = E // n_head

    def kernel(x_ref, wqkv_ref, bqkv_ref, wo_ref, bo_ref,
               wfc_ref, bfc_ref, wpj_ref, bpj_ref, o_ref):
        x = x_ref[...]                                     # (L, E)  one batch elem

        # ---- ln_1 (folded) + fused QKV projection: one MXU pass ----
        qkv = jnp.dot(x, wqkv_ref[...],
                      preferred_element_type=jnp.float32) + bqkv_ref[...]   # (L, 3E)

        # ---- multi-head attention, heads unrolled, all in VMEM ----
        wo = wo_ref[...]                                   # (E, E)
        attn = jnp.zeros((L, E), jnp.float32)
        for h in range(n_head):
            q = qkv[:, h * hd:(h + 1) * hd]                # (L, hd)
            k = qkv[:, E + h * hd:E + (h + 1) * hd]
            v = qkv[:, 2 * E + h * hd:2 * E + (h + 1) * hd]
            # scores = q @ k^T  (contract the feature dim of both operands)
            s = jax.lax.dot_general(q, k, (((1,), (1,)), ((), ())),
                                    preferred_element_type=jnp.float32) * scale
            s = s - jnp.max(s, axis=-1, keepdims=True)
            p = jnp.exp(s)
            p = p * pl.reciprocal(jnp.sum(p, axis=-1, keepdims=True), approx=True)
            oh = jnp.dot(p, v, preferred_element_type=jnp.float32)          # (L, hd)
            # fold the head merge into the out-projection (lane-dense output)
            attn = attn + jnp.dot(oh, wo[h * hd:(h + 1) * hd, :],
                                  preferred_element_type=jnp.float32)       # (L, E)

        # ---- residual 1 (in-kernel) ----
        x1 = x + attn + bo_ref[...]

        # ---- ln_2 (folded) + MLP: c_fc -> QuickGELU -> c_proj ----
        hmid = jnp.dot(x1, wfc_ref[...],
                       preferred_element_type=jnp.float32) + bfc_ref[...]   # (L, 4E)
        hmid = hmid * jax.nn.sigmoid(1.702 * hmid)          # QuickGELU
        x2 = x1 + jnp.dot(hmid, wpj_ref[...],
                          preferred_element_type=jnp.float32) + bpj_ref[...]

        # ---- residual 2 already included; store ----
        o_ref[...] = x2.astype(o_ref.dtype)

    return kernel


def residual_attention_block(x, folded, n_head):
    """x: (L, N, E) in torch MHA batch_first=False layout. Returns (L, N, E)."""
    L, N, E = x.shape
    assert E % n_head == 0
    hd = E // n_head
    scale = 1.0 / float(hd ** 0.5)
    wqkv, bqkv, wo, bo, wfc, bfc, wpj, bpj = folded

    # batch-major internal layout so the "parallel" grid axis has full-extent
    # (L, E) blocks satisfying the (8, 128)/full-dim tiling rule.
    xb = jnp.transpose(x, (1, 0, 2))                        # (N, L, E)

    flops_per_b = (2 * L * E * 3 * E            # QKV
                   + 2 * 2 * L * L * E          # scores + p@v over all heads
                   + 2 * L * E * E              # out-proj
                   + 2 * L * E * 4 * E          # c_fc
                   + 2 * L * 4 * E * E)         # c_proj
    bytes_weights = sum(int(a.size) * 4 for a in folded)
    cost = pl.CostEstimate(
        flops=N * flops_per_b,
        transcendentals=N * (n_head * L * L + L * 4 * E),
        bytes_accessed=2 * int(x.size) * 4 + bytes_weights,
    )

    weight_specs = [pl.BlockSpec(a.shape, lambda n: (0, 0))
                    for a in (wqkv, bqkv, wo, bo, wfc, bfc, wpj, bpj)]

    out = pl.pallas_call(
        _make_block_kernel(L, E, n_head, scale),
        out_shape=jax.ShapeDtypeStruct((N, L, E), x.dtype),
        grid=(N,),
        in_specs=[pl.BlockSpec((None, L, E), lambda n: (n, 0, 0))] + weight_specs,
        out_specs=pl.BlockSpec((None, L, E), lambda n: (n, 0, 0)),
        compiler_params=pltpu.CompilerParams(
            dimension_semantics=("parallel",)),
        cost_estimate=cost,
    )(xb, wqkv, bqkv, wo, bo, wfc, bfc, wpj, bpj)

    return jnp.transpose(out, (1, 0, 2))                    # back to (L, N, E)


# ------------------------- parameters & BN folding -------------------------

def init_block_params(key, d_model, n_head, w_scale=0.1):
    f32 = jnp.float32
    E = d_model
    ks = jax.random.split(key, 16)

    def lin(k, fi, fo):
        return w_scale * jax.random.normal(k, (fi, fo), f32)

    def bn_init(k, d):
        # PyTorch construction-time defaults are gamma=1, beta=0, mean=0, var=1
        # (a near no-op in eval mode); randomize slightly so the BN-folding
        # path is genuinely exercised by the reference check.
        k1, k2, k3, k4 = jax.random.split(k, 4)
        return dict(
            gamma=1.0 + 0.1 * jax.random.normal(k1, (d,), f32),
            beta=0.1 * jax.random.normal(k2, (d,), f32),
            mean=0.1 * jax.random.normal(k3, (d,), f32),
            var=jax.random.uniform(k4, (d,), f32, 0.5, 1.5),
        )

    return dict(
        wq=lin(ks[0], E, E), wk=lin(ks[1], E, E), wv=lin(ks[2], E, E),
        bq=0.05 * jax.random.normal(ks[3], (E,), f32),
        bk=0.05 * jax.random.normal(ks[4], (E,), f32),
        bv=0.05 * jax.random.normal(ks[5], (E,), f32),
        wo=lin(ks[6], E, E),
        bo=0.05 * jax.random.normal(ks[7], (E,), f32),
        w_fc=lin(ks[8], E, 4 * E),
        b_fc=0.05 * jax.random.normal(ks[9], (4 * E,), f32),
        w_proj=lin(ks[10], 4 * E, E),
        b_proj=0.05 * jax.random.normal(ks[11], (E,), f32),
        ln_1=bn_init(ks[12], E), ln_2=bn_init(ks[13], E),
    )


def fold_block_params(p, eps=1e-5):
    """Fold the eval-mode BatchNorm1d affines into the consuming matmuls and
    fuse wq/wk/wv into one (E, 3E) weight.  Returns the kernel arg tuple."""
    def affine(ln):
        s = ln["gamma"] * jax.lax.rsqrt(ln["var"] + eps)
        t = ln["beta"] - ln["mean"] * s
        return s, t

    s1, t1 = affine(p["ln_1"])
    wqkv = jnp.concatenate([p["wq"], p["wk"], p["wv"]], axis=1)   # (E, 3E)
    bqkv = jnp.concatenate([p["bq"], p["bk"], p["bv"]], axis=0)   # (3E,)
    wqkv_f = s1[:, None] * wqkv
    bqkv_f = (bqkv + t1 @ wqkv)[None, :]                          # (1, 3E)

    s2, t2 = affine(p["ln_2"])
    wfc_f = s2[:, None] * p["w_fc"]
    bfc_f = (p["b_fc"] + t2 @ p["w_fc"])[None, :]                 # (1, 4E)

    return (wqkv_f, bqkv_f,
            p["wo"], p["bo"][None, :],
            wfc_f, bfc_f,
            p["w_proj"], p["b_proj"][None, :])


# ------------------------- pure-JAX reference (torch order) -----------------

def reference_block(p, x, n_head, eps=1e-5):
    L, N, E = x.shape
    hd = E // n_head

    def bn(y, ln):
        s = ln["gamma"] * jax.lax.rsqrt(ln["var"] + eps)
        return (y - ln["mean"]) * s + ln["beta"]

    y = bn(x, p["ln_1"])
    q = (y @ p["wq"] + p["bq"]).reshape(L, N, n_head, hd)
    k = (y @ p["wk"] + p["bk"]).reshape(L, N, n_head, hd)
    v = (y @ p["wv"] + p["bv"]).reshape(L, N, n_head, hd)
    s = jnp.einsum("lnhd,mnhd->nhlm", q, k) / jnp.sqrt(jnp.float32(hd))
    a = jax.nn.softmax(s, axis=-1)
    o = jnp.einsum("nhlm,mnhd->lnhd", a, v).reshape(L, N, E)
    x = x + (o @ p["wo"] + p["bo"])
    y = bn(x, p["ln_2"])
    h = y @ p["w_fc"] + p["b_fc"]
    h = h * jax.nn.sigmoid(1.702 * h)
    return x + (h @ p["w_proj"] + p["b_proj"])


# ---------------------------------- main ------------------------------------

if __name__ == "__main__":
    key = jax.random.PRNGKey(0)
    k_param, k_x = jax.random.split(key)

    L, N, d_model, n_head = 8, 2, 32, 4          # (seq, batch, width), 4 heads
    params = init_block_params(k_param, d_model, n_head)
    folded = fold_block_params(params)
    x = jax.random.normal(k_x, (L, N, d_model), jnp.float32)

    fwd = jax.jit(residual_attention_block, static_argnums=2)
    out = jax.block_until_ready(fwd(x, folded, n_head))

    assert out.shape == (L, N, d_model), out.shape
    assert bool(jnp.all(jnp.isfinite(out)))

    ref = reference_block(params, x, n_head)
    max_err = float(jnp.max(jnp.abs(out - ref)))
    assert max_err < 5e-2, f"max abs err vs reference: {max_err}"

    print("KERNEL_OK")
</pallas_src>

<mosaic_0001>
module attributes {stable_mosaic.version = 11 : i64} {
  func.func @kernel(%arg0: i32, %arg1: memref<1x8x32xf32, #tpu.memory_space<vmem>>, %arg2: memref<32x96xf32, #tpu.memory_space<vmem>>, %arg3: memref<1x96xf32, #tpu.memory_space<vmem>>, %arg4: memref<32x32xf32, #tpu.memory_space<vmem>>, %arg5: memref<1x32xf32, #tpu.memory_space<vmem>>, %arg6: memref<32x128xf32, #tpu.memory_space<vmem>>, %arg7: memref<1x128xf32, #tpu.memory_space<vmem>>, %arg8: memref<128x32xf32, #tpu.memory_space<vmem>>, %arg9: memref<1x32xf32, #tpu.memory_space<vmem>>, %arg10: memref<1x8x32xf32, #tpu.memory_space<vmem>>) attributes {dimension_semantics = [#tpu.dimension_semantics<parallel>], iteration_bounds = array<i64: 2>, scalar_prefetch = 0 : i64, scratch_operands = 0 : i64, tpu.core_type = #tpu.core_type<tc>, window_params = [{transform_indices = @transform_0, window_bounds = array<i64: 1, 8, 32>}, {pipeline_mode = #tpu.pipeline_mode<synchronous>, transform_indices = @transform_1, window_bounds = array<i64: 32, 96>}, {pipeline_mode = #tpu.pipeline_mode<synchronous>, transform_indices = @transform_2, window_bounds = array<i64: 1, 96>}, {pipeline_mode = #tpu.pipeline_mode<synchronous>, transform_indices = @transform_3, window_bounds = array<i64: 32, 32>}, {pipeline_mode = #tpu.pipeline_mode<synchronous>, transform_indices = @transform_4, window_bounds = array<i64: 1, 32>}, {pipeline_mode = #tpu.pipeline_mode<synchronous>, transform_indices = @transform_5, window_bounds = array<i64: 32, 128>}, {pipeline_mode = #tpu.pipeline_mode<synchronous>, transform_indices = @transform_6, window_bounds = array<i64: 1, 128>}, {pipeline_mode = #tpu.pipeline_mode<synchronous>, transform_indices = @transform_7, window_bounds = array<i64: 128, 32>}, {pipeline_mode = #tpu.pipeline_mode<synchronous>, transform_indices = @transform_8, window_bounds = array<i64: 1, 32>}, {transform_indices = @transform_9, window_bounds = array<i64: 1, 8, 32>}]} {
    %c0 = arith.constant 0 : index
    %c0_0 = arith.constant 0 : index
    %c0_1 = arith.constant 0 : index
    %0 = vector.load %arg1[%c0, %c0_0, %c0_1] : memref<1x8x32xf32, #tpu.memory_space<vmem>>, vector<1x8x32xf32>
    %1 = vector.shape_cast %0 : vector<1x8x32xf32> to vector<8x32xf32>
    %c0_2 = arith.constant 0 : index
    %c0_3 = arith.constant 0 : index
    %2 = vector.load %arg2[%c0_2, %c0_3] : memref<32x96xf32, #tpu.memory_space<vmem>>, vector<32x96xf32>
    %cst = arith.constant dense<0.000000e+00> : vector<8x96xf32>
    %3 = tpu.matmul %1, %2, %cst {dimension_numbers = #tpu.dot_dimension_numbers<[1], [0], [0], [1], [0, 0, 1, 1], [], []>} : vector<8x32xf32>, vector<32x96xf32>, vector<8x96xf32> -> vector<8x96xf32>
    %c0_4 = arith.constant 0 : index
    %c0_5 = arith.constant 0 : index
    %4 = vector.load %arg3[%c0_4, %c0_5] : memref<1x96xf32, #tpu.memory_space<vmem>>, vector<1x96xf32>
    %5 = vector.broadcast %4 : vector<1x96xf32> to vector<8x96xf32>
    %6 = arith.addf %3, %5 : vector<8x96xf32>
    %c0_6 = arith.constant 0 : index
    %c0_7 = arith.constant 0 : index
    %7 = vector.load %arg4[%c0_6, %c0_7] : memref<32x32xf32, #tpu.memory_space<vmem>>, vector<32x32xf32>
    %cst_8 = arith.constant 0.000000e+00 : f32
    %8 = vector.broadcast %cst_8 : f32 to vector<8x32xf32>
    %9 = vector.extract_strided_slice %6 {offsets = [0, 0], sizes = [8, 8], strides = [1, 1]} : vector<8x96xf32> to vector<8x8xf32>
    %10 = vector.extract_strided_slice %6 {offsets = [0, 32], sizes = [8, 8], strides = [1, 1]} : vector<8x96xf32> to vector<8x8xf32>
    %11 = vector.extract_strided_slice %6 {offsets = [0, 64], sizes = [8, 8], strides = [1, 1]} : vector<8x96xf32> to vector<8x8xf32>
    %cst_9 = arith.constant dense<0.000000e+00> : vector<8x8xf32>
    %12 = tpu.matmul %9, %10, %cst_9 {dimension_numbers = #tpu.dot_dimension_numbers<[1], [1], [0], [0], [0, 0, 1, 0], [], []>} : vector<8x8xf32>, vector<8x8xf32>, vector<8x8xf32> -> vector<8x8xf32>
    %cst_10 = arith.constant 0.353553385 : f32
    %13 = vector.broadcast %cst_10 : f32 to vector<8x8xf32>
    %14 = arith.mulf %12, %13 : vector<8x8xf32>
    %cst_11 = arith.constant dense<0xFF800000> : vector<8xf32>
    %15 = vector.multi_reduction <maximumf>, %14, %cst_11 [1] : vector<8x8xf32> to vector<8xf32>
    %16 = vector.shape_cast %15 : vector<8xf32> to vector<8x1xf32>
    %17 = vector.broadcast %16 : vector<8x1xf32> to vector<8x8xf32>
    %18 = arith.subf %14, %17 : vector<8x8xf32>
    %19 = math.exp %18 : vector<8x8xf32>
    %cst_12 = arith.constant dense<0.000000e+00> : vector<8xf32>
    %20 = vector.multi_reduction <add>, %19, %cst_12 [1] : vector<8x8xf32> to vector<8xf32>
    %21 = vector.shape_cast %20 : vector<8xf32> to vector<8x1xf32>
    %22 = tpu.reciprocal %21 {approx = true} : vector<8x1xf32> -> vector<8x1xf32>
    %23 = vector.broadcast %22 : vector<8x1xf32> to vector<8x8xf32>
    %24 = arith.mulf %19, %23 : vector<8x8xf32>
    %cst_13 = arith.constant dense<0.000000e+00> : vector<8x8xf32>
    %25 = tpu.matmul %24, %11, %cst_13 {dimension_numbers = #tpu.dot_dimension_numbers<[1], [0], [0], [1], [0, 0, 1, 1], [], []>} : vector<8x8xf32>, vector<8x8xf32>, vector<8x8xf32> -> vector<8x8xf32>
    %26 = vector.extract_strided_slice %7 {offsets = [0, 0], sizes = [8, 32], strides = [1, 1]} : vector<32x32xf32> to vector<8x32xf32>
    %cst_14 = arith.constant dense<0.000000e+00> : vector<8x32xf32>
    %27 = tpu.matmul %25, %26, %cst_14 {dimension_numbers = #tpu.dot_dimension_numbers<[1], [0], [0], [1], [0, 0, 1, 1], [], []>} : vector<8x8xf32>, vector<8x32xf32>, vector<8x32xf32> -> vector<8x32xf32>
    %28 = arith.addf %8, %27 : vector<8x32xf32>
    %29 = vector.extract_strided_slice %6 {offsets = [0, 8], sizes = [8, 8], strides = [1, 1]} : vector<8x96xf32> to vector<8x8xf32>
    %30 = vector.extract_strided_slice %6 {offsets = [0, 40], sizes = [8, 8], strides = [1, 1]} : vector<8x96xf32> to vector<8x8xf32>
    %31 = vector.extract_strided_slice %6 {offsets = [0, 72], sizes = [8, 8], strides = [1, 1]} : vector<8x96xf32> to vector<8x8xf32>
    %cst_15 = arith.constant dense<0.000000e+00> : vector<8x8xf32>
    %32 = tpu.matmul %29, %30, %cst_15 {dimension_numbers = #tpu.dot_dimension_numbers<[1], [1], [0], [0], [0, 0, 1, 0], [], []>} : vector<8x8xf32>, vector<8x8xf32>, vector<8x8xf32> -> vector<8x8xf32>
    %cst_16 = arith.constant 0.353553385 : f32
    %33 = vector.broadcast %cst_16 : f32 to vector<8x8xf32>
    %34 = arith.mulf %32, %33 : vector<8x8xf32>
    %cst_17 = arith.constant dense<0xFF800000> : vector<8xf32>
    %35 = vector.multi_reduction <maximumf>, %34, %cst_17 [1] : vector<8x8xf32> to vector<8xf32>
    %36 = vector.shape_cast %35 : vector<8xf32> to vector<8x1xf32>
    %37 = vector.broadcast %36 : vector<8x1xf32> to vector<8x8xf32>
    %38 = arith.subf %34, %37 : vector<8x8xf32>
    %39 = math.exp %38 : vector<8x8xf32>
    %cst_18 = arith.constant dense<0.000000e+00> : vector<8xf32>
    %40 = vector.multi_reduction <add>, %39, %cst_18 [1] : vector<8x8xf32> to vector<8xf32>
    %41 = vector.shape_cast %40 : vector<8xf32> to vector<8x1xf32>
    %42 = tpu.reciprocal %41 {approx = true} : vector<8x1xf32> -> vector<8x1xf32>
    %43 = vector.broadcast %42 : vector<8x1xf32> to vector<8x8xf32>
    %44 = arith.mulf %39, %43 : vector<8x8xf32>
    %cst_19 = arith.constant dense<0.000000e+00> : vector<8x8xf32>
    %45 = tpu.matmul %44, %31, %cst_19 {dimension_numbers = #tpu.dot_dimension_numbers<[1], [0], [0], [1], [0, 0, 1, 1], [], []>} : vector<8x8xf32>, vector<8x8xf32>, vector<8x8xf32> -> vector<8x8xf32>
    %46 = vector.extract_strided_slice %7 {offsets = [8, 0], sizes = [8, 32], strides = [1, 1]} : vector<32x32xf32> to vector<8x32xf32>
    %cst_20 = arith.constant dense<0.000000e+00> : vector<8x32xf32>
    %47 = tpu.matmul %45, %46, %cst_20 {dimension_numbers = #tpu.dot_dimension_numbers<[1], [0], [0], [1], [0, 0, 1, 1], [], []>} : vector<8x8xf32>, vector<8x32xf32>, vector<8x32xf32> -> vector<8x32xf32>
    %48 = arith.addf %28, %47 : vector<8x32xf32>
    %49 = vector.extract_strided_slice %6 {offsets = [0, 16], sizes = [8, 8], strides = [1, 1]} : vector<8x96xf32> to vector<8x8xf32>
    %50 = vector.extract_strided_slice %6 {offsets = [0, 48], sizes = [8, 8], strides = [1, 1]} : vector<8x96xf32> to vector<8x8xf32>
    %51 = vector.extract_strided_slice %6 {offsets = [0, 80], sizes = [8, 8], strides = [1, 1]} : vector<8x96xf32> to vector<8x8xf32>
    %cst_21 = arith.constant dense<0.000000e+00> : vector<8x8xf32>
    %52 = tpu.matmul %49, %50, %cst_21 {dimension_numbers = #tpu.dot_dimension_numbers<[1], [1], [0], [0], [0, 0, 1, 0], [], []>} : vector<8x8xf32>, vector<8x8xf32>, vector<8x8xf32> -> vector<8x8xf32>
    %cst_22 = arith.constant 0.353553385 : f32
    %53 = vector.broadcast %cst_22 : f32 to vector<8x8xf32>
    %54 = arith.mulf %52, %53 : vector<8x8xf32>
    %cst_23 = arith.constant dense<0xFF800000> : vector<8xf32>
    %55 = vector.multi_reduction <maximumf>, %54, %cst_23 [1] : vector<8x8xf32> to vector<8xf32>
    %56 = vector.shape_cast %55 : vector<8xf32> to vector<8x1xf32>
    %57 = vector.broadcast %56 : vector<8x1xf32> to vector<8x8xf32>
    %58 = arith.subf %54, %57 : vector<8x8xf32>
    %59 = math.exp %58 : vector<8x8xf32>
    %cst_24 = arith.constant dense<0.000000e+00> : vector<8xf32>
    %60 = vector.multi_reduction <add>, %59, %cst_24 [1] : vector<8x8xf32> to vector<8xf32>
    %61 = vector.shape_cast %60 : vector<8xf32> to vector<8x1xf32>
    %62 = tpu.reciprocal %61 {approx = true} : vector<8x1xf32> -> vector<8x1xf32>
    %63 = vector.broadcast %62 : vector<8x1xf32> to vector<8x8xf32>
    %64 = arith.mulf %59, %63 : vector<8x8xf32>
    %cst_25 = arith.constant dense<0.000000e+00> : vector<8x8xf32>
    %65 = tpu.matmul %64, %51, %cst_25 {dimension_numbers = #tpu.dot_dimension_numbers<[1], [0], [0], [1], [0, 0, 1, 1], [], []>} : vector<8x8xf32>, vector<8x8xf32>, vector<8x8xf32> -> vector<8x8xf32>
    %66 = vector.extract_strided_slice %7 {offsets = [16, 0], sizes = [8, 32], strides = [1, 1]} : vector<32x32xf32> to vector<8x32xf32>
    %cst_26 = arith.constant dense<0.000000e+00> : vector<8x32xf32>
    %67 = tpu.matmul %65, %66, %cst_26 {dimension_numbers = #tpu.dot_dimension_numbers<[1], [0], [0], [1], [0, 0, 1, 1], [], []>} : vector<8x8xf32>, vector<8x32xf32>, vector<8x32xf32> -> vector<8x32xf32>
    %68 = arith.addf %48, %67 : vector<8x32xf32>
    %69 = vector.extract_strided_slice %6 {offsets = [0, 24], sizes = [8, 8], strides = [1, 1]} : vector<8x96xf32> to vector<8x8xf32>
    %70 = vector.extract_strided_slice %6 {offsets = [0, 56], sizes = [8, 8], strides = [1, 1]} : vector<8x96xf32> to vector<8x8xf32>
    %71 = vector.extract_strided_slice %6 {offsets = [0, 88], sizes = [8, 8], strides = [1, 1]} : vector<8x96xf32> to vector<8x8xf32>
    %cst_27 = arith.constant dense<0.000000e+00> : vector<8x8xf32>
    %72 = tpu.matmul %69, %70, %cst_27 {dimension_numbers = #tpu.dot_dimension_numbers<[1], [1], [0], [0], [0, 0, 1, 0], [], []>} : vector<8x8xf32>, vector<8x8xf32>, vector<8x8xf32> -> vector<8x8xf32>
    %cst_28 = arith.constant 0.353553385 : f32
    %73 = vector.broadcast %cst_28 : f32 to vector<8x8xf32>
    %74 = arith.mulf %72, %73 : vector<8x8xf32>
    %cst_29 = arith.constant dense<0xFF800000> : vector<8xf32>
    %75 = vector.multi_reduction <maximumf>, %74, %cst_29 [1] : vector<8x8xf32> to vector<8xf32>
    %76 = vector.shape_cast %75 : vector<8xf32> to vector<8x1xf32>
    %77 = vector.broadcast %76 : vector<8x1xf32> to vector<8x8xf32>
    %78 = arith.subf %74, %77 : vector<8x8xf32>
    %79 = math.exp %78 : vector<8x8xf32>
    %cst_30 = arith.constant dense<0.000000e+00> : vector<8xf32>
    %80 = vector.multi_reduction <add>, %79, %cst_30 [1] : vector<8x8xf32> to vector<8xf32>
    %81 = vector.shape_cast %80 : vector<8xf32> to vector<8x1xf32>
    %82 = tpu.reciprocal %81 {approx = true} : vector<8x1xf32> -> vector<8x1xf32>
    %83 = vector.broadcast %82 : vector<8x1xf32> to vector<8x8xf32>
    %84 = arith.mulf %79, %83 : vector<8x8xf32>
    %cst_31 = arith.constant dense<0.000000e+00> : vector<8x8xf32>
    %85 = tpu.matmul %84, %71, %cst_31 {dimension_numbers = #tpu.dot_dimension_numbers<[1], [0], [0], [1], [0, 0, 1, 1], [], []>} : vector<8x8xf32>, vector<8x8xf32>, vector<8x8xf32> -> vector<8x8xf32>
    %86 = vector.extract_strided_slice %7 {offsets = [24, 0], sizes = [8, 32], strides = [1, 1]} : vector<32x32xf32> to vector<8x32xf32>
    %cst_32 = arith.constant dense<0.000000e+00> : vector<8x32xf32>
    %87 = tpu.matmul %85, %86, %cst_32 {dimension_numbers = #tpu.dot_dimension_numbers<[1], [0], [0], [1], [0, 0, 1, 1], [], []>} : vector<8x8xf32>, vector<8x32xf32>, vector<8x32xf32> -> vector<8x32xf32>
    %88 = arith.addf %68, %87 : vector<8x32xf32>
    %89 = arith.addf %1, %88 : vector<8x32xf32>
    %c0_33 = arith.constant 0 : index
    %c0_34 = arith.constant 0 : index
    %90 = vector.load %arg5[%c0_33, %c0_34] : memref<1x32xf32, #tpu.memory_space<vmem>>, vector<1x32xf32>
    %91 = vector.broadcast %90 : vector<1x32xf32> to vector<8x32xf32>
    %92 = arith.addf %89, %91 : vector<8x32xf32>
    %c0_35 = arith.constant 0 : index
    %c0_36 = arith.constant 0 : index
    %93 = vector.load %arg6[%c0_35, %c0_36] : memref<32x128xf32, #tpu.memory_space<vmem>>, vector<32x128xf32>
    %cst_37 = arith.constant dense<0.000000e+00> : vector<8x128xf32>
    %94 = tpu.matmul %92, %93, %cst_37 {dimension_numbers = #tpu.dot_dimension_numbers<[1], [0], [0], [1], [0, 0, 1, 1], [], []>} : vector<8x32xf32>, vector<32x128xf32>, vector<8x128xf32> -> vector<8x128xf32>
    %c0_38 = arith.constant 0 : index
    %c0_39 = arith.constant 0 : index
    %95 = vector.load %arg7[%c0_38, %c0_39] : memref<1x128xf32, #tpu.memory_space<vmem>>, vector<1x128xf32>
    %96 = vector.broadcast %95 : vector<1x128xf32> to vector<8x128xf32>
    %97 = arith.addf %94, %96 : vector<8x128xf32>
    %cst_40 = arith.constant 1.702000e+00 : f32
    %98 = vector.broadcast %cst_40 : f32 to vector<8x128xf32>
    %99 = arith.mulf %98, %97 : vector<8x128xf32>
    %100 = arith.negf %99 : vector<8x128xf32>
    %101 = math.exp %100 : vector<8x128xf32>
    %cst_41 = arith.constant 1.000000e+00 : f32
    %102 = vector.broadcast %cst_41 : f32 to vector<8x128xf32>
    %103 = arith.addf %102, %101 : vector<8x128xf32>
    %104 = arith.divf %102, %103 : vector<8x128xf32>
    %105 = arith.mulf %97, %104 : vector<8x128xf32>
    %c0_42 = arith.constant 0 : index
    %c0_43 = arith.constant 0 : index
    %106 = vector.load %arg8[%c0_42, %c0_43] : memref<128x32xf32, #tpu.memory_space<vmem>>, vector<128x32xf32>
    %cst_44 = arith.constant dense<0.000000e+00> : vector<8x32xf32>
    %107 = tpu.matmul %105, %106, %cst_44 {dimension_numbers = #tpu.dot_dimension_numbers<[1], [0], [0], [1], [0, 0, 1, 1], [], []>} : vector<8x128xf32>, vector<128x32xf32>, vector<8x32xf32> -> vector<8x32xf32>
    %108 = arith.addf %92, %107 : vector<8x32xf32>
    %c0_45 = arith.constant 0 : index
    %c0_46 = arith.constant 0 : index
    %109 = vector.load %arg9[%c0_45, %c0_46] : memref<1x32xf32, #tpu.memory_space<vmem>>, vector<1x32xf32>
    %110 = vector.broadcast %109 : vector<1x32xf32> to vector<8x32xf32>
    %111 = arith.addf %108, %110 : vector<8x32xf32>
    %c0_47 = arith.constant 0 : index
    %c0_48 = arith.constant 0 : index
    %c0_49 = arith.constant 0 : index
    %112 = vector.load %arg10[%c0_47, %c0_48, %c0_49] : memref<1x8x32xf32, #tpu.memory_space<vmem>>, vector<1x8x32xf32>
    %113 = vector.shape_cast %112 : vector<1x8x32xf32> to vector<8x32xf32>
    %114 = vector.shape_cast %111 : vector<8x32xf32> to vector<1x8x32xf32>
    tpu.vector_store %arg10[%c0_47, %c0_48, %c0_49], %114 {strides = array<i32>} : memref<1x8x32xf32, #tpu.memory_space<vmem>>, vector<1x8x32xf32>,
    return
  }
  func.func @transform_0(%arg0: i32) -> (i32, i32, i32) {
    %c0_i32 = arith.constant 0 : i32
    %c0_i32_0 = arith.constant 0 : i32
    %c0_i32_1 = arith.constant 0 : i32
    return %arg0, %c0_i32, %c0_i32_0 : i32, i32, i32
  }
  func.func @transform_1(%arg0: i32) -> (i32, i32) {
    %c0_i32 = arith.constant 0 : i32
    %c0_i32_0 = arith.constant 0 : i32
    %c0_i32_1 = arith.constant 0 : i32
    return %c0_i32, %c0_i32_0 : i32, i32
  }
  func.func @transform_2(%arg0: i32) -> (i32, i32) {
    %c0_i32 = arith.constant 0 : i32
    %c0_i32_0 = arith.constant 0 : i32
    %c0_i32_1 = arith.constant 0 : i32
    return %c0_i32, %c0_i32_0 : i32, i32
  }
  func.func @transform_3(%arg0: i32) -> (i32, i32) {
    %c0_i32 = arith.constant 0 : i32
    %c0_i32_0 = arith.constant 0 : i32
    %c0_i32_1 = arith.constant 0 : i32
    return %c0_i32, %c0_i32_0 : i32, i32
  }
  func.func @transform_4(%arg0: i32) -> (i32, i32) {
    %c0_i32 = arith.constant 0 : i32
    %c0_i32_0 = arith.constant 0 : i32
    %c0_i32_1 = arith.constant 0 : i32
    return %c0_i32, %c0_i32_0 : i32, i32
  }
  func.func @transform_5(%arg0: i32) -> (i32, i32) {
    %c0_i32 = arith.constant 0 : i32
    %c0_i32_0 = arith.constant 0 : i32
    %c0_i32_1 = arith.constant 0 : i32
    return %c0_i32, %c0_i32_0 : i32, i32
  }
  func.func @transform_6(%arg0: i32) -> (i32, i32) {
    %c0_i32 = arith.constant 0 : i32
    %c0_i32_0 = arith.constant 0 : i32
    %c0_i32_1 = arith.constant 0 : i32
    return %c0_i32, %c0_i32_0 : i32, i32
  }
  func.func @transform_7(%arg0: i32) -> (i32, i32) {
    %c0_i32 = arith.constant 0 : i32
    %c0_i32_0 = arith.constant 0 : i32
    %c0_i32_1 = arith.constant 0 : i32
    return %c0_i32, %c0_i32_0 : i32, i32
  }
  func.func @transform_8(%arg0: i32) -> (i32, i32) {
    %c0_i32 = arith.constant 0 : i32
    %c0_i32_0 = arith.constant 0 : i32
    %c0_i32_1 = arith.constant 0 : i32
    return %c0_i32, %c0_i32_0 : i32, i32
  }
  func.func @transform_9(%arg0: i32) -> (i32, i32, i32) {
    %c0_i32 = arith.constant 0 : i32
    %c0_i32_0 = arith.constant 0 : i32
    %c0_i32_1 = arith.constant 0 : i32
    return %arg0, %c0_i32, %c0_i32_0 : i32, i32, i32
  }
}

</mosaic_0001>

<bundles_post_ra>
// kernel: residual_attention_block.1
= control target key start
LH: loop header
LB: loop body
LE: loop exit
PB: predicated region body
PF: predicated region fallthrough
CT: control target
= control target key end

     0   :  { %s1017_s30 = smov 0   ;;  %s1182_s0 = inlined_call_operand.vmem [shape: f32[2,8,32], index: 0, kind: input, shape index: {}]   ;;  %s1183_s1 = inlined_call_operand.vmem [shape: f32[32,96], index: 1, kind: input, shape index: {}]   ;;  %s1184_s2 = inlined_call_operand.vmem [shape: f32[1,96], index: 2, kind: input, shape index: {}]   ;;  %s1185_s3 = inlined_call_operand.vmem [shape: f32[32,32], index: 3, kind: input, shape index: {}]   ;;  %s1186_s4 = inlined_call_operand.vmem [shape: f32[1,32], index: 4, kind: input, shape index: {}]   ;;  %s1187_s5 = inlined_call_operand.vmem [shape: f32[32,128], index: 5, kind: input, shape index: {}]   ;;  %s1188_s6 = inlined_call_operand.vmem [shape: f32[1,128], index: 6, kind: input, shape index: {}]   ;;  %s1189_s7 = inlined_call_operand.vmem [shape: f32[128,32], index: 7, kind: input, shape index: {}]   ;;  %s1190_s8 = inlined_call_operand.vmem [shape: f32[1,32], index: 8, kind: input, shape index: {}]   ;;  %s1191_s9 = inlined_call_operand.vmem [shape: f32[2,8,32], index: 9, kind: output, shape index: {}]  }
   0x1 LB: > { %s877_s10 = sadd.s32 4294967295, %s954_s30   ;;  %p881_p0 = scmp.ge.s32.totalorder %s954_s30, 1  ;;  %s954_s30 = sphi %s1017_s30, %s19_s30  }
   0x2   : > { %p286_p1 = scmp.lt.s32.totalorder %s954_s30, 3 }
   0x4   : > { %p287_p2 = pnand %p881_p0, %p286_p1 }
   0x5   : > { %p320_p3 = scmp.lt.s32.totalorder (!%p287_p2), %s877_s10, 1  ;;  %s956_s25 = smov (!%p287_p2), 112  }
   0x6   : > { %290 = sbr.rel (%p287_p2) target bundleno = 1637 (0x665), region = 56  ;;  %s957_s26 = smov (!%p287_p2), 120  }
   0x7   : > { %s958_s27 = smov (!%p287_p2), 96   ;;  %s959_s28 = smov (!%p287_p2), 80  }
   0x8   : > { %s960_s29 = smov (!%p287_p2), 88   ;;  %s961_s11 = smov (!%p287_p2), 64  }
   0x9   : > { %s962_s12 = smov (!%p287_p2), 72   ;;  %s963_s13 = smov (!%p287_p2), 104  }
   0xa   : > { %s964_s14 = smov (!%p287_p2), 40   ;;  %s965_s15 = smov (!%p287_p2), 56  }
   0xb   : > { %v332_v0 = vld [vmem:[%s1183_s1 + $0x18] sm:$0xff]  ;;  %v331_v1 = vld [vmem:[%s1183_s1 + $0x10] sm:$0xff]  ;;  %v330_v2 = vld [vmem:[%s1183_s1 + $0x8] sm:$0xff]  ;;  %s1193_s10 = smov (!%p320_p3, %s877_s10), 1  ;;  %vm337_vm0 = vcmask 261120   ;;  %vm368_vm1 = vcmask 64512  }
   0xc   : > { %353 = vmatpush.msra.mxu0 %v332_v0  ;;  %v329_v3 = vld [vmem:[%s1183_s1] sm:$0xff]  ;;  %s882_s19 = sshll.u32 %s1193_s10, 3  ;;  %s966_s16 = smov 48   ;;  %v362_v53 = vld [vmem:[%s1185_s3 + $0x8] sm:$0xff]  ;;  %v363_v55 = vld [vmem:[%s1185_s3 + $0x10] sm:$0xff] }
   0xd   : > { %s323_s22 = scalar_lea.vmem %s1182_s0, %s882_s19  ;;  %v924_v5 = vld [vmem:[%s1184_s2] ss:$0 sm:$0xff]  ;;  %s327_s20 = scalar_lea.vmem %s1191_s9, %s882_s19 }
   0xe   : > { %354 = vmatpush.msra.mxu0 %v331_v1  ;;  %v1045_v4 = vld [vmem:[%s323_s22] sm:$0xff] }
   0xf   : > { %v361_v52 = vld [vmem:[%s1185_s3] sm:$0xff] }
  0x10   : > { %355 = vmatpush.msra.mxu0 %v330_v2  ;;  %538 = vmatpush.msra.mxu3 %v361_v52 }
  0x12   : > { %356 = vmatpush.msra.mxu0 %v329_v3 }
  0x13   : > { %884 = vmatmul.msk.f32.vlgmr.msra.gmra.mxu0 %vm337_vm0, %v1045_v4 }
  0x90   : > { %v358_v6 = vpop.f32.mrf.mxu0 }
  0x91   : > { %v1052_v7 = vadd.f32 %v924_v5, %v358_v6  ;;  %v364_v6 = vld [vmem:[%s1185_s3 + $0x18] sm:$0xff] }
  0x93   : > { %543 = vrot.lane.b32.xlu2 %v1052_v7, %s956_s25  ;;  %431 = vrot.lane.b32.xlu1 %v1052_v7, %s957_s26 }
  0x94   : > { %366 = vrot.lane.b32.xlu0 %v1052_v7, %s958_s27 }
  0x9b   : > { %545 = vrot.lane.b32.xlu1 %v1052_v7, %s959_s28 }
  0x9c   : > { %433 = vrot.lane.b32.xlu0 %v1052_v7, %s960_s29 }
  0xed   : > { %v544_v12 = vpop.permute.xlu2 %543 }
 0x105   : > { %v432_v8 = vpop.permute.xlu1 %431 }
 0x106   : > { %v367_v9 = vpop.permute.xlu0 %366 }
 0x107   : > { %885 = vmatpush.xpose.msk.msra.mxu1 %vm368_vm1, %v367_v9  ;;  %v731_v9 = vld [vmem:[%s1187_s5 + $0x10] sm:$0xff] }
 0x10a   : > { %886 = vmatmul.msk.f32.vlgmr.msra.gmra.mxu1 %vm368_vm1, %v1052_v7 }
 0x10b   : > { %515 = vmatpush.msrb.mxu1 %v362_v53 }
 0x10d   : > { %v546_v10 = vpop.permute.xlu1 %545  ;;  %627 = vmatpush.msra.mxu1 %v363_v55  ;;  %v927_v55 = vld [vmem:[%s1190_s8] ss:$0 sm:$0xff] }
 0x10e   : > { %v434_v11 = vpop.permute.xlu0 %433 }
 0x10f   : > { %888 = vmatpush.xpose.msk.msrb.mxu0 %vm368_vm1, %v434_v11  ;;  %v729_v11 = vld [vmem:[%s1187_s5] sm:$0xff] }
 0x112   : > { %889 = vmatmul.msk.f32.vlgmr.msrb.gmra.mxu0 %vm368_vm1, %v432_v8  ;;  %v732_v8 = vld [vmem:[%s1187_s5 + $0x18] sm:$0xff] }
 0x113   : > { %893 = vmatpush.xpose.msk.msra.mxu0 %vm368_vm1, %v546_v10  ;;  %v730_v10 = vld [vmem:[%s1187_s5 + $0x8] sm:$0xff] }
 0x11a   : > { %894 = vmatmul.msk.f32.vlgmr.msra.gmra.mxu0 %vm368_vm1, %v544_v12 }
 0x187   : > { %v390_v13 = vpop.f32.mrf.mxu1 }
 0x188   : > { %v393_v14 = vmul.f32 0.35355338, %v390_v13 }
 0x18a   : > { %v394_v15 = vsel %vm368_vm1, %v393_v14, -inf }
 0x18b   : > { %395 = vmax.xlane.f32.xlu2 %v394_v15 }
 0x18f   : > { %v456_v16 = vpop.f32.mrf.mxu0 }
 0x190   : > { %v459_v17 = vmul.f32 0.35355338, %v456_v16 }
 0x192   : > { %v460_v18 = vsel %vm368_vm1, %v459_v17, -inf }
 0x193   : > { %461 = vmax.xlane.f32.xlu0 %v460_v18 }
 0x197   : > { %v568_v19 = vpop.f32.mrf.mxu0 }
 0x198   : > { %v571_v20 = vmul.f32 0.35355338, %v568_v19  ;;  %v925_v19 = vld [vmem:[%s1186_s4] ss:$0 sm:$0xff] }
 0x19a   : > { %v572_v21 = vsel %vm368_vm1, %v571_v20, -inf }
 0x19b   : > { %573 = vmax.xlane.f32.xlu1 %v572_v21 }
 0x1a7   : > { %405 = vrot.lane.b32.xlu0 %v1052_v7, %s961_s11 }
 0x1af   : > { %635 = vrot.lane.b32.xlu0 %v1052_v7, %s962_s12 }
 0x1b7   : > { %633 = vrot.lane.b32.xlu0 %v1052_v7, %s963_s13 }
 0x1bf   : > { %673 = vrot.lane.b32.xlu0 %v1052_v7, %s964_s14 }
 0x1fe   : > { %v396_v22 = vpop.xlane.xlu2 %395 }
 0x1ff   : > { %v397_v23 = vsub.f32 %v393_v14, %v396_v22  ;;  %v796_v22 = vld [vmem:[%s1189_s7 + $0x78] sm:$0xff] }
 0x200   : > { %797 = vmatpush.msrb.mxu3 %v796_v22 }
 0x201   : > { %v398_v24 = vmul.f32 1.442695, %v397_v23  ;;  %v795_v23 = vld [vmem:[%s1189_s7 + $0x70] sm:$0xff] }
 0x202   : > { %798 = vmatpush.msrb.mxu3 %v795_v23 }
 0x203   : > { %928 = vpow2.f32 %v398_v24  ;;  %v794_v24 = vld [vmem:[%s1189_s7 + $0x68] sm:$0xff] }
 0x204   : > { %799 = vmatpush.msrb.mxu3 %v794_v24 }
 0x206   : > { %v462_v25 = vpop.xlane.xlu0 %461 }
 0x207   : > { %v463_v26 = vsub.f32 %v459_v17, %v462_v25  ;;  %v792_v25 = vld [vmem:[%s1189_s7 + $0x58] sm:$0xff] }
 0x209   : > { %v929_v27 = vpop.eup %928  ;;  %v464_v28 = vmul.f32 1.442695, %v463_v26  ;;  %v791_v26 = vld [vmem:[%s1189_s7 + $0x50] sm:$0xff] }
 0x20a   : > { %v400_v29 = vsel %vm368_vm1, %v929_v27, 0.0 }
 0x20b   : > { %930 = vpow2.f32 %v464_v28  ;;  %401 = vadd.xlane.f32.xlu2 %v400_v29  ;;  %v789_v28 = vld [vmem:[%s1189_s7 + $0x40] sm:$0xff]  ;;  %v788_v29 = vld [vmem:[%s1189_s7 + $0x38] sm:$0xff] }
 0x20e   : > { %v574_v30 = vpop.xlane.xlu1 %573 }
 0x20f   : > { %v575_v31 = vsub.f32 %v571_v20, %v574_v30  ;;  %v787_v30 = vld [vmem:[%s1189_s7 + $0x30] sm:$0xff] }
 0x211   : > { %v931_v32 = vpop.eup %930  ;;  %v576_v33 = vmul.f32 1.442695, %v575_v31  ;;  %v786_v31 = vld [vmem:[%s1189_s7 + $0x28] sm:$0xff] }
 0x212   : > { %v466_v34 = vsel %vm368_vm1, %v931_v32, 0.0 }
 0x213   : > { %932 = vpow2.f32 %v576_v33  ;;  %467 = vadd.xlane.f32.xlu2 %v466_v34  ;;  %v784_v33 = vld [vmem:[%s1189_s7 + $0x18] sm:$0xff]  ;;  %v926_v34 = vld [vmem:[%s1188_s6] ss:$0 sm:$0xff] }
 0x219   : > { %v933_v35 = vpop.eup %932  ;;  %v406_v36 = vpop.permute.xlu0 %405 }
 0x21a   : > { %426 = vmatpush.msra.mxu2 %v406_v36  ;;  %v578_v37 = vsel %vm368_vm1, %v933_v35, 0.0 }
 0x21b   : > { %579 = vadd.xlane.f32.xlu1 %v578_v37  ;;  %v782_v37 = vld [vmem:[%s1189_s7 + $0x8] sm:$0xff] }
 0x221   : > { %v636_v38 = vpop.permute.xlu0 %635 }
 0x229   : > { %v634_v39 = vpop.permute.xlu0 %633 }
 0x22b   : > { %471 = vrot.lane.b32.xlu2 %v1052_v7, %s965_s15 }
 0x231   : > { %v674_v40 = vpop.permute.xlu0 %673 }
 0x232   : > { %694 = vmatpush.msrb.mxu0 %v674_v40 }
 0x234   : > { %583 = vrot.lane.b32.xlu1 %v1052_v7, %s966_s16 }
 0x27e   : > { %v402_v41 = vpop.xlane.xlu2 %401 }
 0x27f   : > { %934 = vrcp.f32 %v402_v41 }
 0x285   : > { %v935_v42 = vpop.eup %934 }
 0x286   : > { %v468_v43 = vpop.xlane.xlu2 %467  ;;  %v404_v44 = vmul.f32 %v935_v42, %v929_v27  ;;  %v790_v27 = vld [vmem:[%s1189_s7 + $0x48] sm:$0xff] }
 0x287   : > { %936 = vrcp.f32 %v468_v43 }
 0x288   : > { %887 = vmatmul.msk.f32.vlgmr.msra.gmra.mxu2 %vm368_vm1, %v404_v44 }
 0x28d   : > { %v937_v45 = vpop.eup %936 }
 0x28e   : > { %v472_v46 = vpop.permute.xlu2 %471  ;;  %v470_v47 = vmul.f32 %v937_v45, %v931_v32  ;;  %v580_v48 = vpop.xlane.xlu1 %579  ;;  %v785_v32 = vld [vmem:[%s1189_s7 + $0x20] sm:$0xff] }
 0x28f   : > { %492 = vmatpush.msrb.mxu2 %v472_v46  ;;  %938 = vrcp.f32 %v580_v48 }
 0x290   : > { %890 = vmatmul.msk.f32.vlgmr.msrb.gmra.mxu2 %vm368_vm1, %v470_v47 }
 0x295   : > { %v939_v49 = vpop.eup %938 }
 0x296   : > { %v582_v50 = vmul.f32 %v939_v49, %v933_v35  ;;  %v783_v35 = vld [vmem:[%s1189_s7 + $0x10] sm:$0xff] }
 0x2a6   : > { %v584_v51 = vpop.permute.xlu1 %583 }
 0x2a7   : > { %604 = vmatpush.msra.mxu2 %v584_v51 }
 0x2a8   : > { %895 = vmatmul.msk.f32.vlgmr.msra.gmra.mxu2 %vm368_vm1, %v582_v50 }
 0x2a9   : > { %897 = vmatpush.xpose.msk.msrb.mxu2 %vm368_vm1, %v636_v38 }
 0x2ad   : > { %717 = vmatpush.msra.mxu2 %v364_v6 }
 0x2b0   : > { %898 = vmatmul.msk.f32.vlgmr.msrb.gmra.mxu2 %vm368_vm1, %v634_v39  ;;  %v781_v39 = vld [vmem:[%s1189_s7] sm:$0xff] }
 0x30b   : > { %v428_v54 = vpop.f32.mrf.mxu2 }
 0x30c   : > { %892 = vmatmul.msk.f32.vlgmr.msra.gmra.mxu3 %vm368_vm1, %v428_v54 }
 0x313   : > { %v494_v56 = vpop.f32.mrf.mxu2 }
 0x314   : > { %891 = vmatmul.msk.f32.vlgmr.msrb.gmra.mxu1 %vm368_vm1, %v494_v56 }
 0x315   : > { %752 = vmatpush.msrb.mxu1 %v732_v8 }
 0x317   : > { %753 = vmatpush.msrb.mxu1 %v731_v9 }
 0x319   : > { %754 = vmatpush.msrb.mxu1 %v730_v10 }
 0x31b   : > { %755 = vmatpush.msrb.mxu1 %v729_v11 }
 0x32b   : > { %v606_v57 = vpop.f32.mrf.mxu2 }
 0x32c   : > { %896 = vmatmul.msk.f32.vlgmr.msra.gmra.mxu1 %vm368_vm1, %v606_v57 }
 0x333   : > { %v658_v58 = vpop.f32.mrf.mxu2 }
 0x334   : > { %v661_v59 = vmul.f32 0.35355338, %v658_v58 }
 0x336   : > { %v662_v60 = vsel %vm368_vm1, %v661_v59, -inf }
 0x337   : > { %663 = vmax.xlane.f32.xlu2 %v662_v60 }
 0x38f   : > { %v540_v13 = vpop.f32.mrf.mxu3 }
 0x391   : > { %v517_v12 = vpop.f32.mrf.mxu1 }
 0x392   : > { %v541_v15 = vadd.f32 %v540_v13, %v517_v12 }
 0x3a9   : > { %v629_v14 = vpop.f32.mrf.mxu1 }
 0x3aa   : > { %v664_v61 = vpop.xlane.xlu2 %663  ;;  %v632_v16 = vadd.f32 %v629_v14, %v541_v15 }
 0x3ab   : > { %v665_v62 = vsub.f32 %v661_v59, %v664_v61 }
 0x3ad   : > { %v666_v63 = vmul.f32 1.442695, %v665_v62 }
 0x3af   : > { %940 = vpow2.f32 %v666_v63 }
 0x3b5   : > { %v941_v0 = vpop.eup %940 }
 0x3b6   : > { %v668_v1 = vsel %vm368_vm1, %v941_v0, 0.0 }
 0x3b7   : > { %669 = vadd.xlane.f32.xlu1 %v668_v1 }
 0x42a   : > { %v670_v2 = vpop.xlane.xlu1 %669 }
 0x42b   : > { %942 = vrcp.f32 %v670_v2 }
 0x431   : > { %v943_v3 = vpop.eup %942 }
 0x432   : > { %v672_v5 = vmul.f32 %v943_v3, %v941_v0 }
 0x434   : > { %899 = vmatmul.msk.f32.vlgmr.msrb.gmra.mxu0 %vm368_vm1, %v672_v5 }
 0x4b1   : > { %v696_v7 = vpop.f32.mrf.mxu0 }
 0x4b2   : > { %900 = vmatmul.msk.f32.vlgmr.msra.gmra.mxu2 %vm368_vm1, %v696_v7 }
 0x535   : > { %v719_v17 = vpop.f32.mrf.mxu2 }
 0x536   : > { %v722_v18 = vadd.f32 %v719_v17, %v632_v16 }
 0x538   : > { %v723_v20 = vadd.f32 %v722_v18, %v1045_v4  ;;  %v793_v4 = vld [vmem:[%s1189_s7 + $0x60] sm:$0xff] }
 0x539   : > { %800 = vmatpush.msrb.mxu3 %v793_v4 }
 0x53a   : > { %v728_v21 = vadd.f32 %v925_v19, %v723_v20 }
 0x53b   : > { %801 = vmatpush.msrb.mxu3 %v792_v25 }
 0x53c   : > { %901 = vmatmul.msk.f32.vlgmr.msrb.gmra.mxu1 %vm337_vm0, %v728_v21 }
 0x53d   : > { %802 = vmatpush.msrb.mxu3 %v791_v26 }
 0x53f   : > { %803 = vmatpush.msrb.mxu3 %v790_v27 }
 0x541   : > { %804 = vmatpush.msrb.mxu3 %v789_v28 }
 0x543   : > { %805 = vmatpush.msrb.mxu3 %v788_v29 }
 0x545   : > { %806 = vmatpush.msrb.mxu3 %v787_v30 }
 0x547   : > { %807 = vmatpush.msrb.mxu3 %v786_v31 }
 0x549   : > { %808 = vmatpush.msrb.mxu3 %v785_v32 }
 0x54b   : > { %809 = vmatpush.msrb.mxu3 %v784_v33 }
 0x54d   : > { %810 = vmatpush.msrb.mxu3 %v783_v35 }
 0x54f   : > { %811 = vmatpush.msrb.mxu3 %v782_v37 }
 0x551   : > { %812 = vmatpush.msrb.mxu3 %v781_v39 }
 0x5b9   : > { %v757_v36 = vpop.f32.mrf.mxu1 }
 0x5ba   : > { %v758_v38 = vadd.f32 %v926_v34, %v757_v36 }
 0x5bc   : > { %v902_v40 = vmul.f32 -1.702, %v758_v38 }
 0x5be   : > { %v762_v41 = vmul.f32 1.442695, %v902_v40 }
 0x5c0   : > { %944 = vpow2.f32 %v762_v41 }
 0x5c6   : > { %v945_v42 = vpop.eup %944 }
 0x5c7   : > { %v764_v43 = vadd.f32 1.0, %v945_v42 }
 0x5c9   : > { %946 = vrcp.f32 %v764_v43  ;;  %v776_v47 = vand.u32 2147483648, %v764_v43  ;;  %v774_v49 = vand.u32 2147483647, %v764_v43  ;;  %vm770_vm3 = vweird.f32 %v764_v43 }
 0x5cb   : > { %v777_v51 = vor.u32 1.1754944e-38, %v776_v47  ;;  %vm775_vm5 = vcmp.eq.f32.partialorder %v774_v49, 8.507059e+37 }
 0x5cf   : > { %v947_v44 = vpop.eup %946 }
 0x5d0   : > { %v766_v45 = vmul.f32 %v947_v44, %v764_v43  ;;  %vm771_vm2 = vweird.f32 %v947_v44 }
 0x5d1   : > { %vm772_vm4 = vmor %vm770_vm3, %vm771_vm2 }
 0x5d2   : > { %v767_v46 = vsub.f32 1.0, %v766_v45 }
 0x5d4   : > { %v768_v48 = vmul.f32 %v947_v44, %v767_v46 }
 0x5d6   : > { %v769_v50 = vadd.f32 %v947_v44, %v768_v48 }
 0x5d8   : > { %v773_v52 = vsel %vm772_vm4, %v947_v44, %v769_v50 }
 0x5d9   : > { %v778_v53 = vsel %vm775_vm5, %v777_v51, %v773_v52 }
 0x5da   : > { %v780_v54 = vmul.f32 %v778_v53, %v758_v38 }
 0x5dc   : > { %813 = vmatmul.f32.vlgmr.msrb.gmra.mxu3 %v780_v54 }
 0x65f   : > { %v814_v56 = vpop.f32.mrf.mxu3 }
 0x660   : > { %v817_v57 = vadd.f32 %v814_v56, %v728_v21 }
 0x662   : > { %v822_v58 = vadd.f32 %v927_v55, %v817_v57 }
 0x664   : > { %823 = vst.msk [vmem:[%s327_s20] sm:$0xff] %vm337_vm0, %v822_v58 }
 0x665 PF: > { %s19_s30 = sadd.s32 1, %s954_s30  }
 0x666   : > { %p16_p4 = scmp.ge.s32.totalorder %s19_s30, 4  }
 0x668   :  { %18 = sbr.rel (!%p16_p4) target bundleno = 1 (0x1), region = 86 }

</bundles_post_ra>
